<compile_context>
chip_gen: v6e
topology: v6e:2x2x1
jax: 0.10.0
libtpu: 0.0.40
codegen_flags: <defaults>
</compile_context>

<pallas_src>
import jax
import jax.numpy as jnp
from jax.experimental import pallas as pl
from jax.experimental.pallas import tpu as pltpu

LANE = 128


def decode_kernel(dic_ref, x_ref, o_ref):
    # dic_ref: (TT, K) normalized dictionary (constant index_map -> VMEM-resident)
    # x_ref:   (K, Pblk) coefficients for one (batch, lane-tile) grid step
    # o_ref:   (TT, Pblk)
    # NOTE: default MXU precision passes the 1e-4 check; precision=HIGHEST would be
    # essentially free here (DMA-bound) if a tighter match to f32 torch.matmul is
    # ever required.
    o_ref[...] = jnp.dot(dic_ref[...], x_ref[...],
                         preferred_element_type=jnp.float32).astype(o_ref.dtype)


def _build_dictionary(rr, theta, TT):
    """Column-L2-normalized real dictionary, shape (TT, 4N+1), plain jnp (tiny)."""
    rr = rr.astype(jnp.float32).reshape(1, -1)          # (1, N)
    theta = theta.astype(jnp.float32).reshape(1, -1)    # (1, N)
    i_int = jnp.arange(TT, dtype=jnp.int32)[:, None]    # (TT, 1)
    i_f = i_int.astype(jnp.float32)

    # rr^i with an integer exponent, robust for rr <= 0 (matches torch.pow).
    alt = jnp.where((i_int & 1) == 1, -1.0, 1.0).astype(jnp.float32)   # (-1)^i
    abs_rr = jnp.abs(rr)
    safe = jnp.where(abs_rr > 0.0, abs_rr, 1.0)
    abs_pow = jnp.exp(i_f * jnp.log(safe))                              # |rr|^i
    abs_pow = jnp.where(abs_rr > 0.0, abs_pow,
                        jnp.where(i_int == 0, 1.0, 0.0))                # 0^0=1, 0^i=0
    rr_pow = abs_pow * jnp.where(rr < 0.0, alt, 1.0)                    # rr^i
    neg_rr_pow = rr_pow * alt                                           # (-rr)^i

    cos = jnp.cos(i_f * theta)
    sin = jnp.sin(i_f * theta)
    ones = jnp.ones((TT, 1), jnp.float32)
    dic = jnp.concatenate(
        [ones, rr_pow * cos, neg_rr_pow * cos, rr_pow * sin, neg_rr_pow * sin],
        axis=1)                                                          # (TT, K)

    G = jnp.sqrt(jnp.sum(dic * dic, axis=0, keepdims=True))             # (1, K)
    G = jnp.where(G == 0.0, jnp.sqrt(jnp.float32(TT)), G)
    return dic / G


def _pick_lane_tile(B, K, TT, P):
    """Lane (P) tile: 128-multiple, sized against ~24 MiB of double-buffered VMEM."""
    p_round = pl.cdiv(P, LANE) * LANE
    # Per lane: double-buffered x block (K rows) + out block (TT rows), f32.
    budget = 24 << 20
    cap = (budget // (8 * (K + TT))) // LANE * LANE
    cap = max(LANE, min(cap, 16384))
    p_blk = min(p_round, cap)
    # v7x has 2 TensorCores per chip: when the batch axis alone can't feed both
    # cores, split the lane axis so the ("parallel","parallel") grid has >= 2 tiles.
    if B * pl.cdiv(P, p_blk) < 2 and p_blk > LANE:
        p_blk = max(LANE, pl.cdiv(p_round // LANE, 2) * LANE)
    return p_blk


def decoder_forward(rr, theta, x, T, PRE):
    """Pallas implementation of Decoder.forward (DyanOF)."""
    B, K, P = x.shape
    N = rr.shape[0]
    assert K == 4 * N + 1, "x must have 4*len(rr)+1 atom rows"
    TT = T + PRE

    # Dictionary build is a few KiB of work: do it in plain XLA, not a pallas_call.
    dic = _build_dictionary(rr, theta, TT)

    p_blk = _pick_lane_tile(B, K, TT, P)
    grid = (B, pl.cdiv(P, p_blk))

    return pl.pallas_call(
        decode_kernel,
        out_shape=jax.ShapeDtypeStruct((B, TT, P), x.dtype),
        grid_spec=pltpu.PrefetchScalarGridSpec(
            num_scalar_prefetch=0,
            grid=grid,
            in_specs=[
                pl.BlockSpec((TT, K), lambda b, p: (0, 0)),               # dictionary
                pl.BlockSpec((None, K, p_blk), lambda b, p: (b, 0, p)),   # x (whole K)
            ],
            out_specs=pl.BlockSpec((None, TT, p_blk), lambda b, p: (b, 0, p)),
        ),
        compiler_params=pltpu.CompilerParams(
            dimension_semantics=("parallel", "parallel"),
            vmem_limit_bytes=32 << 20,
        ),
    )(dic, x)


def reference(rr, theta, x, T, PRE):
    """Pure-JAX port of creatRealDictionary + matmul (for verification)."""
    TT = T + PRE
    rows = []
    for i in range(TT):
        W1 = (rr ** i) * jnp.cos(i * theta)
        W2 = ((-rr) ** i) * jnp.cos(i * theta)
        W3 = (rr ** i) * jnp.sin(i * theta)
        W4 = ((-rr) ** i) * jnp.sin(i * theta)
        rows.append(jnp.concatenate([jnp.ones((1,), jnp.float32), W1, W2, W3, W4]))
    dic = jnp.stack(rows, axis=0)                       # (TT, 4N+1)
    G = jnp.linalg.norm(dic, axis=0)
    G = jnp.where(G == 0.0, jnp.sqrt(jnp.float32(TT)), G)
    dic = dic / G
    return jnp.einsum("tk,bkp->btp", dic, x)


if __name__ == "__main__":
    key = jax.random.PRNGKey(0)
    k_rr, k_th, k_x = jax.random.split(key, 3)

    # Deterministic synthetic parameters / inputs (small shapes).
    N, T, PRE = 16, 6, 2            # 4N+1 = 65 atoms, T+PRE = 8 dictionary rows
    B, P = 2, 128                   # batch, pixels/features
    K = 4 * N + 1

    rr = jax.random.uniform(k_rr, (N,), jnp.float32, 0.5, 1.05)   # pole magnitudes
    theta = jax.random.uniform(k_th, (N,), jnp.float32, 0.0, jnp.pi)
    x = jax.random.normal(k_x, (B, K, P), jnp.float32)

    out = jax.block_until_ready(decoder_forward(rr, theta, x, T, PRE))

    ref = reference(rr, theta, x, T, PRE)
    assert out.shape == (B, T + PRE, P)
    if not jnp.allclose(out, ref, rtol=1e-4, atol=1e-4):
        raise SystemExit(
            "mismatch: max abs err = %e" % float(jnp.max(jnp.abs(out - ref))))
    print("KERNEL_OK")
</pallas_src>

<mosaic_0001>
module attributes {stable_mosaic.version = 11 : i64} {
  func.func @decode_kernel(%arg0: i32, %arg1: i32, %arg2: memref<8x65xf32, #tpu.memory_space<vmem>>, %arg3: memref<1x65x128xf32, #tpu.memory_space<vmem>>, %arg4: memref<1x8x128xf32, #tpu.memory_space<vmem>>) attributes {dimension_semantics = [#tpu.dimension_semantics<parallel>, #tpu.dimension_semantics<parallel>], iteration_bounds = array<i64: 2, 1>, scalar_prefetch = 0 : i64, scratch_operands = 0 : i64, tpu.core_type = #tpu.core_type<tc>, window_params = [{pipeline_mode = #tpu.pipeline_mode<synchronous>, transform_indices = @transform_0, window_bounds = array<i64: 8, 65>}, {transform_indices = @transform_1, window_bounds = array<i64: 1, 65, 128>}, {transform_indices = @transform_2, window_bounds = array<i64: 1, 8, 128>}]} {
    %c0 = arith.constant 0 : index
    %c0_0 = arith.constant 0 : index
    %0 = vector.load %arg2[%c0, %c0_0] : memref<8x65xf32, #tpu.memory_space<vmem>>, vector<8x65xf32>
    %c0_1 = arith.constant 0 : index
    %c0_2 = arith.constant 0 : index
    %c0_3 = arith.constant 0 : index
    %1 = vector.load %arg3[%c0_1, %c0_2, %c0_3] : memref<1x65x128xf32, #tpu.memory_space<vmem>>, vector<1x65x128xf32>
    %2 = vector.shape_cast %1 : vector<1x65x128xf32> to vector<65x128xf32>
    %cst = arith.constant dense<0.000000e+00> : vector<8x128xf32>
    %3 = tpu.matmul %0, %2, %cst {dimension_numbers = #tpu.dot_dimension_numbers<[1], [0], [0], [1], [0, 0, 1, 1], [], []>} : vector<8x65xf32>, vector<65x128xf32>, vector<8x128xf32> -> vector<8x128xf32>
    %c0_4 = arith.constant 0 : index
    %c0_5 = arith.constant 0 : index
    %c0_6 = arith.constant 0 : index
    %4 = vector.load %arg4[%c0_4, %c0_5, %c0_6] : memref<1x8x128xf32, #tpu.memory_space<vmem>>, vector<1x8x128xf32>
    %5 = vector.shape_cast %4 : vector<1x8x128xf32> to vector<8x128xf32>
    %6 = vector.shape_cast %3 : vector<8x128xf32> to vector<1x8x128xf32>
    tpu.vector_store %arg4[%c0_4, %c0_5, %c0_6], %6 {strides = array<i32>} : memref<1x8x128xf32, #tpu.memory_space<vmem>>, vector<1x8x128xf32>,
    return
  }
  func.func @transform_0(%arg0: i32, %arg1: i32) -> (i32, i32) {
    %c0_i32 = arith.constant 0 : i32
    %c0_i32_0 = arith.constant 0 : i32
    %c0_i32_1 = arith.constant 0 : i32
    return %c0_i32, %c0_i32_0 : i32, i32
  }
  func.func @transform_1(%arg0: i32, %arg1: i32) -> (i32, i32, i32) {
    %c0_i32 = arith.constant 0 : i32
    %c0_i32_0 = arith.constant 0 : i32
    return %arg0, %c0_i32, %arg1 : i32, i32, i32
  }
  func.func @transform_2(%arg0: i32, %arg1: i32) -> (i32, i32, i32) {
    %c0_i32 = arith.constant 0 : i32
    %c0_i32_0 = arith.constant 0 : i32
    return %arg0, %c0_i32, %arg1 : i32, i32, i32
  }
}

</mosaic_0001>

<bundles_post_ra>
// kernel: tpu_custom_call.1
= control target key start
LH: loop header
LB: loop body
LE: loop exit
PB: predicated region body
PF: predicated region fallthrough
CT: control target
= control target key end

     0   :  { %7 = vsyncpa [#allocation3], 0  ;;  %s657_s0 = inlined_call_operand.vmem [shape: f32[8,65], index: 0, kind: input, shape index: {}]   ;;  %s658_s1 = inlined_call_operand.vmem [shape: f32[2,65,128], index: 1, kind: input, shape index: {}]   ;;  %s659_s2 = inlined_call_operand.hbm [shape: f32[2,8,128], index: 2, kind: output, shape index: {}]  }
   0x1   :  { %9 = vsyncpa [#allocation3 + $0x1], 0  ;;  %s543_s9 = smov 0   ;;  %s545_s10 = smov 0  }
   0x2   :  { %s547_s11 = smov 0   ;;  %s549_s12 = smov 0  }
   0x3   :  { %s551_s13 = smov 0   ;;  %s553_s14 = smov 0  }
   0x4 LB: > { %s345_s15 = sadd.s32 4294967295, %s523_s14   ;;  %s346_s16 = sadd.s32 4294967294, %s523_s14   ;;  %s523_s14 = sphi %s553_s14, %s15_s14   ;;  %s519_s13 = sphi %s551_s13, %s666_s13   ;;  %s515_s12 = sphi %s549_s12, %s665_s12   ;;  %s511_s11 = sphi %s547_s11, %s664_s11   ;;  %s507_s10 = sphi %s545_s10, %s663_s10   ;;  %s503_s9 = sphi %s543_s9, %s662_s9  }
   0x5   : > { %s27_s17 = sadd.s32 1, %s519_s13  ;;  %s85_s18 = sadd.s32 1, %s511_s11 }
   0x6   : > { %p29_p0 = scmp.ge.s32.totalorder %s27_s17, 2  ;;  %p95_p1 = scmp.ne.s32.totalorder %s511_s11, %s507_s10 }
   0x7   : > { %p96_p2 = scmp.eq.s32.totalorder %s345_s15, 1  ;;  %p101_p3 = scmp.ne.s32.totalorder %s507_s10, %s503_s9 }
   0x8   : > { %s668_s17 = smov (%p29_p0, %s27_s17), 0  ;;  %p102_p5 = scmp.eq.s32.totalorder %s346_s16, 1 }
   0x9   : > { %p583_p4 = por %p96_p2, %p95_p1  ;;  %s80_s20 = ssub.s32 %s519_s13, %s668_s17 }
   0xa   : > { %p349_p6 = scmp.ge.s32.totalorder %s523_s14, 1  ;;  %p83_p7 = scmp.eq.s32.totalorder %s80_s20, 0 }
   0xb   : > { %p590_p8 = por %p102_p5, %p101_p3  ;;  %p134_p9 = scmp.lt.s32.totalorder %s523_s14, 3 }
   0xc   : > { %s596_s22 = scalar_select %p83_p7, %s511_s11, %s85_s18  }
   0xd   : > { %p135_p10 = pnand %p349_p6, %p134_p9 }
   0xe   : > { %p159_p11 = scmp.lt.s32.totalorder (!%p135_p10), %s515_s12, 1  ;;  %s156_s30 = sand.u32 (!%p135_p10), 1, %s507_s10  }
   0xf   : > { %138 = sbr.rel (%p135_p10) target bundleno = 250 (0xfa), region = 28  ;;  %s350_s3 = sshll.u32 (!%p135_p10), %s156_s30, 3 }
  0x10   : > { %s158_s4 = scalar_lea.vmem (!%p135_p10), [#allocation2], %s350_s3  ;;  %s355_s6 = sshll.u32 (!%p135_p10), %s515_s12, 7 }
  0x11   : > { %s271_s5 = sshll.u32 (!%p135_p10), %s158_s4, 4  ;;  %s613_s15 = scalar_lea.hbm (!%p135_p10), %s659_s2, %s355_s6  ;;  %s608_s5 = int_to_ptr.vmem [resolvable:$true] %s271_s5 }
  0x12   : > { %s257_s16 = scalar_lea.sflag (!%p135_p10), [#allocation3], %s156_s30  ;;  %s447_s18 = scalar_lea.vmem (!%p135_p10), %s608_s5, 128 }
  0x13   : > { %p448_p12 = scmp.ne.s32.totalorder (!%p135_p10), %s608_s5, %s447_s18 }
  0x14   : > { %v525_v0 = vmov 0.0   ;;  %vm526_vm0 = vmmov 0   ;;  %s160_s23 = scalar_select %p159_p11, %s515_s12, 1  ;;  %vm181_vm1 = vcmask 1040384   ;;  %v167_v10 = vld [vmem:[%s657_s0] sm:$0xff]  ;;  %vm177_vm2 = vcmask 531456  }
  0x15   : > { %368 = vmatprep.subr.mxu0 %v525_v0  ;;  %386 = vmatprep.mubr.msk.f32.mxu0 %vm526_vm0, %v525_v0  ;;  %p449_p13 = pnand %p448_p12, %p583_p4  ;;  %s527_s12 = smov [#allocation2]  }
  0x16   : > { %s389_s24 = smul.u32 72, %s160_s23  ;;  %s451_s20 = sshll.u32 %s527_s12, 4  ;;  %s452_s20 = int_to_ptr.vmem [resolvable:$false] %s451_s20 }
  0x17   : > { %p450_p0 = pneg %p449_p13  ;;  %s453_s23 = scalar_lea.vmem %s452_s20, 256 }
  0x18   : > { %s166_s27 = scalar_lea.vmem %s658_s1, %s389_s24  ;;  %p454_p1 = scmp.lt.s32.totalorder %s608_s5, %s452_s20 }
  0x19   : > { %v176_v1 = vld [vmem:[%s166_s27 + $0x40] sm:$0x1]  ;;  %v175_v2 = vld [vmem:[%s166_s27 + $0x38] sm:$0xff]  ;;  %v174_v3 = vld [vmem:[%s166_s27 + $0x30] sm:$0xff]  ;;  %p455_p2 = scmp.lt.s32.totalorder %s453_s23, %s447_s18 }
  0x1a   : > { %369 = vmatpush3.msk.msra.mxu0 %vm181_vm1, %v176_v1  ;;  %v173_v4 = vld [vmem:[%s166_s27 + $0x28] sm:$0xff]  ;;  %v172_v5 = vld [vmem:[%s166_s27 + $0x20] sm:$0xff]  ;;  %v171_v6 = vld [vmem:[%s166_s27 + $0x18] sm:$0xff] }
  0x1b   : > { %370 = vmatprep.subr.mxu0 %v525_v0  ;;  %v170_v7 = vld [vmem:[%s166_s27 + $0x10] sm:$0xff]  ;;  %v169_v8 = vld [vmem:[%s166_s27 + $0x8] sm:$0xff]  ;;  %v168_v9 = vld [vmem:[%s166_s27] sm:$0xff]  ;;  %p456_p3 = por %p455_p2, %p454_p1 }
  0x1c   : > { %371 = vmatpush3.msra.mxu0 %v175_v2 }
  0x1d   : > { %372 = vmatprep.subr.mxu0 %v525_v0  ;;  %p457_p5 = pnand %p456_p3, %p450_p0 }
  0x1e   : > { %373 = vmatpush3.msra.mxu0 %v174_v3 }
  0x1f   : > { %374 = vmatprep.subr.mxu0 %v525_v0 }
  0x20   : > { %375 = vmatpush3.msra.mxu0 %v173_v4 }
  0x21   : > { %376 = vmatprep.subr.mxu0 %v525_v0 }
  0x22   : > { %377 = vmatpush3.msra.mxu0 %v172_v5 }
  0x23   : > { %378 = vmatprep.subr.mxu0 %v525_v0 }
  0x24   : > { %379 = vmatpush3.msra.mxu0 %v171_v6 }
  0x25   : > { %380 = vmatprep.subr.mxu0 %v525_v0 }
  0x26   : > { %381 = vmatpush3.msra.mxu0 %v170_v7 }
  0x27   : > { %382 = vmatprep.subr.mxu0 %v525_v0 }
  0x28   : > { %383 = vmatpush3.msra.mxu0 %v169_v8 }
  0x29   : > { %384 = vmatprep.subr.mxu0 %v525_v0 }
  0x2a   : > { %385 = vmatpush3.msra.mxu0 %v168_v9 }
  0x2b   : > { %387 = vmatmul.mubr.msk.f32.vlgmr.msra.gmra.mxu0 %vm177_vm2, %v167_v10 }
  0xeb   : > { %v251_v11 = vpop.f32.mrf.mxu0 }
  0xec   : > { %255 = vst [vmem:[%s158_s4] sm:$0xff] %v251_v11 }
  0xed   : > { %v388_v12 = vpop.f32.mrf.mxu0 }
  0xee   : > { %460 = shalt.err (!%p457_p5)
}
  0xef   : > { %s461_s24 = scalar_lea.hbm %s613_s15, 128  ;;  %s465_s27 = scalar_lea.hbm %s659_s2, 256 }
  0xf0   : > { %p462_p6 = scmp.ne.s32.totalorder %s613_s15, %s461_s24  ;;  %p466_p10 = scmp.lt.s32.totalorder %s613_s15, %s659_s2 }
  0xf1   : > { %p467_p11 = scmp.lt.s32.totalorder %s465_s27, %s461_s24 }
  0xf2   : > { %p463_p7 = pnand %p462_p6, %p583_p4 }
  0xf3   : > { %p468_p12 = por %p467_p11, %p466_p10 }
  0xf4   : > { %p464_p9 = pneg %p463_p7 }
  0xf6   : > { %p469_p13 = pnand %p468_p12, %p464_p9 }
  0xf8   : > { %472 = shalt.err (!%p469_p13)
}
  0xf9   : > { %390 = dma.vmem_to_hbm [thread:$0]  (%p583_p4), %s608_s5, 128, %s613_s15, %s257_s16  }
  0xfa PF: > { %p396_p0 = scmp.ge.s32.totalorder %s523_s14, 2  ;;  %s283_s30 = sand.u32 1, %s503_s9  }
  0xfb   : > { %s284_s3 = scalar_lea.sflag [#allocation3], %s283_s30 }
  0xfc   : > { %p393_p1 = pnand %p396_p0, %p590_p8 }
  0xfe   : > { %p394_p2 = pneg %p393_p1 }
 0x100   : > { %498 = dma.done.wait (%p394_p2), %s284_s3, 128  }
 0x101   : > { %500 = vsyncadd (%p394_p2), %s284_s3, 4294967168  ;;  %s15_s14 = sadd.s32 1, %s523_s14   ;;  %s662_s9 = smov %s507_s10 }
 0x102   : > { %p12_p3 = scmp.ge.s32.totalorder %s15_s14, 4   ;;  %s663_s10 = smov %s511_s11 }
 0x103   : > { %s664_s11 = smov %s596_s22  ;;  %s665_s12 = smov %s519_s13 }
 0x104   : > { %s666_s13 = smov %s668_s17  ;;  %14 = sbr.rel (!%p12_p3) target bundleno = 4 (0x4), region = 63 }
 0x109   :  { %289 = vsyncpa [#allocation3], 1 }
 0x10a   :  { %291 = vsyncpa [#allocation3 + $0x1], 1 }

</bundles_post_ra>
